<compile_context>
chip_gen: v5e
topology: v5e:2x2
jax: 0.10.0
libtpu: 0.0.40
codegen_flags: <defaults>
</compile_context>

<pallas_src>
import functools
import math

import jax
import jax.numpy as jnp
from jax import lax
from jax.experimental import pallas as pl
from jax.experimental.pallas import tpu as pltpu


# murmur3 fmix32 constants, wrapped to int32.
_M0 = -1640531527   # 0x9E3779B9
_M1 = -2048144789   # 0x85EBCA6B
_M2 = -1028477387   # 0xC2B2AE35


def _srl(z, k):
    """Logical right shift on int32 (arithmetic shift + mask)."""
    return jnp.right_shift(z, k) & jnp.int32((1 << (32 - k)) - 1)


def _hash_bits31(idx, seed):
    """31 well-mixed bits per element from (seed, element index) (fmix32)."""
    z = idx * jnp.int32(_M0) + seed
    z = z ^ _srl(z, 16)
    z = z * jnp.int32(_M1)
    z = z ^ _srl(z, 13)
    z = z * jnp.int32(_M2)
    z = z ^ _srl(z, 16)
    return z & jnp.int32(0x7FFFFFFF)


def _pe_eval_kernel(x_ref, pe_ref, o_ref):
    # x_ref / pe_ref / o_ref: (1, row_block, n_cols)
    o_ref[...] = x_ref[...] + pe_ref[...]


def _pe_train_kernel(seed_ref, x_ref, pe_ref, o_ref, *,
                     dropout_p, row_block, n_rows, n_cols):
    y = x_ref[...] + pe_ref[...]                       # (1, row_block, n_cols)

    # Inverted dropout: keep w.p. (1-p), scale kept values by 1/(1-p).
    r = pl.program_id(0)                               # row-tile index (outer)
    b = pl.program_id(1)                               # batch index (inner)
    row = r * row_block + lax.broadcasted_iota(jnp.int32, y.shape, 1)
    col = lax.broadcasted_iota(jnp.int32, y.shape, 2)
    gidx = (b * n_rows + row) * n_cols + col           # unique per real element
    bits = _hash_bits31(gidx, seed_ref[0])
    keep = bits >= jnp.int32(int(round(dropout_p * (1 << 31))))
    scale = jnp.asarray(1.0 / (1.0 - dropout_p), y.dtype)
    o_ref[...] = jnp.where(keep, y * scale, jnp.zeros_like(y))


def make_positional_encoding_table(d_model: int, max_len: int) -> jnp.ndarray:
    """(1, max_len, d_model) sin/cos table, matching the PyTorch buffer init."""
    position = jnp.arange(max_len, dtype=jnp.float32)[:, None]
    div_term = jnp.exp(
        jnp.arange(0, d_model, 2, dtype=jnp.float32) * (-math.log(10000.0) / d_model)
    )
    angles = position * div_term                                  # (max_len, d_model//2)
    pe = jnp.stack([jnp.sin(angles), jnp.cos(angles)], axis=-1).reshape(max_len, d_model)
    return pe[None]


def positional_encoding_forward(x, pe, *, dropout_p=0.1, training=False,
                                seed=0, row_block=None):
    """x: (B, T, D); pe: (1, max_len, D). Returns (B, T, D), same dtype as x."""
    B, T, D = x.shape
    pe_slice = pe[:, :T, :].astype(x.dtype)   # glue: self.pe[:, :x.size(1)]

    # Lane-dense view: rows of 128 lanes when possible, else (T, D) rows.
    if (T * D) % 128 == 0:
        R, C = (T * D) // 128, 128
    else:
        R, C = T, D
    x3 = x.reshape(B, R, C)
    pe3 = pe_slice.reshape(1, R, C)

    # Row-tile size: biggest tile that comfortably fits scoped VMEM on
    # v5e/v6e/v7x with double buffering (<= 1024*128*4B = 512 KiB per buffer),
    # respecting the (8, 128) block rule (multiple of 8, or the full dim).
    if row_block is None:
        tR = R if R <= 1024 else 1024
    else:
        tR = min(int(row_block), R)
    if tR != R and tR % 8 != 0:
        tR = max(8, (tR // 8) * 8)
    n_row_tiles = pl.cdiv(R, tR)

    # Batch is the innermost grid axis, and the pe index_map ignores it, so the
    # pe tile stays resident in VMEM across the whole batch sweep.
    grid = (n_row_tiles, B)
    x_spec = pl.BlockSpec((1, tR, C), lambda r, b, *_: (b, r, 0))
    pe_spec = pl.BlockSpec((1, tR, C), lambda r, b, *_: (0, r, 0))
    o_spec = pl.BlockSpec((1, tR, C), lambda r, b, *_: (b, r, 0))
    out_shape = jax.ShapeDtypeStruct((B, R, C), x.dtype)
    compiler_params = pltpu.CompilerParams(
        dimension_semantics=("parallel", "arbitrary"))

    use_dropout = bool(training) and float(dropout_p) > 0.0
    if use_dropout:
        kernel = functools.partial(
            _pe_train_kernel, dropout_p=float(dropout_p),
            row_block=tR, n_rows=R, n_cols=C)
        out3 = pl.pallas_call(
            kernel,
            out_shape=out_shape,
            grid_spec=pltpu.PrefetchScalarGridSpec(
                num_scalar_prefetch=1,            # seed -> SMEM
                grid=grid,
                in_specs=[x_spec, pe_spec],
                out_specs=o_spec),
            compiler_params=compiler_params,
        )(jnp.asarray([seed], dtype=jnp.int32), x3, pe3)
    else:
        out3 = pl.pallas_call(
            _pe_eval_kernel,
            out_shape=out_shape,
            grid_spec=pltpu.PrefetchScalarGridSpec(
                num_scalar_prefetch=0,            # no unused seed on eval path
                grid=grid,
                in_specs=[x_spec, pe_spec],
                out_specs=o_spec),
            compiler_params=compiler_params,
        )(x3, pe3)

    return out3.reshape(B, T, D)


if __name__ == "__main__":
    B, T, D = 2, 64, 32
    max_len = 128
    dropout_p = 0.1

    key = jax.random.PRNGKey(0)
    x = jax.random.normal(key, (B, T, D), dtype=jnp.float32)
    pe = make_positional_encoding_table(d_model=D, max_len=max_len)
    ref = x + pe[:, :T, :]

    # --- eval mode (dropout = identity), multi-tile lane-dense grid ---------
    out_eval = jax.block_until_ready(
        positional_encoding_forward(x, pe, dropout_p=dropout_p,
                                    training=False, row_block=8))
    assert out_eval.shape == (B, T, D)
    assert jnp.allclose(out_eval, ref, atol=1e-5, rtol=1e-5)

    # --- training mode: in-kernel hashed dropout ----------------------------
    out_train = jax.block_until_ready(
        positional_encoding_forward(x, pe, dropout_p=dropout_p,
                                    training=True, seed=123, row_block=8))
    assert out_train.shape == (B, T, D)
    scale = 1.0 / (1.0 - dropout_p)
    kept = jnp.isclose(out_train, ref * scale, atol=1e-5, rtol=1e-5)
    dropped = out_train == 0.0
    assert bool(jnp.all(kept | dropped))
    drop_frac = 1.0 - float(jnp.mean(kept.astype(jnp.float32)))
    assert 0.0 < drop_frac < 0.35, drop_frac       # p = 0.1, loose bound

    # --- fallback layout (T*D not a multiple of 128), eval mode -------------
    T2, D2 = 8, 24
    x2 = jax.random.normal(jax.random.PRNGKey(1), (B, T2, D2), dtype=jnp.float32)
    pe2 = make_positional_encoding_table(d_model=D2, max_len=max_len)
    out2 = jax.block_until_ready(
        positional_encoding_forward(x2, pe2, dropout_p=dropout_p, training=False))
    assert jnp.allclose(out2, x2 + pe2[:, :T2, :], atol=1e-5, rtol=1e-5)

    print("KERNEL_OK")
</pallas_src>

<mosaic_0001>
module attributes {stable_mosaic.version = 11 : i64} {
  func.func @_pe_eval_kernel(%arg0: i32, %arg1: i32, %arg2: memref<1x8x128xf32, #tpu.memory_space<vmem>>, %arg3: memref<1x8x128xf32, #tpu.memory_space<vmem>>, %arg4: memref<1x8x128xf32, #tpu.memory_space<vmem>>) attributes {dimension_semantics = [#tpu.dimension_semantics<parallel>, #tpu.dimension_semantics<arbitrary>], iteration_bounds = array<i64: 2, 2>, scalar_prefetch = 0 : i64, scratch_operands = 0 : i64, tpu.core_type = #tpu.core_type<tc>, window_params = [{transform_indices = @transform_0, window_bounds = array<i64: 1, 8, 128>}, {transform_indices = @transform_1, window_bounds = array<i64: 1, 8, 128>}, {transform_indices = @transform_2, window_bounds = array<i64: 1, 8, 128>}]} {
    %c0 = arith.constant 0 : index
    %c0_0 = arith.constant 0 : index
    %c0_1 = arith.constant 0 : index
    %0 = vector.load %arg2[%c0, %c0_0, %c0_1] : memref<1x8x128xf32, #tpu.memory_space<vmem>>, vector<1x8x128xf32>
    %c0_2 = arith.constant 0 : index
    %c0_3 = arith.constant 0 : index
    %c0_4 = arith.constant 0 : index
    %1 = vector.load %arg3[%c0_2, %c0_3, %c0_4] : memref<1x8x128xf32, #tpu.memory_space<vmem>>, vector<1x8x128xf32>
    %2 = arith.addf %0, %1 : vector<1x8x128xf32>
    %c0_5 = arith.constant 0 : index
    %c0_6 = arith.constant 0 : index
    %c0_7 = arith.constant 0 : index
    %3 = vector.load %arg4[%c0_5, %c0_6, %c0_7] : memref<1x8x128xf32, #tpu.memory_space<vmem>>, vector<1x8x128xf32>
    tpu.vector_store %arg4[%c0_5, %c0_6, %c0_7], %2 {strides = array<i32>} : memref<1x8x128xf32, #tpu.memory_space<vmem>>, vector<1x8x128xf32>,
    return
  }
  func.func @transform_0(%arg0: i32, %arg1: i32) -> (i32, i32, i32) {
    %c0_i32 = arith.constant 0 : i32
    %c0_i32_0 = arith.constant 0 : i32
    return %arg1, %arg0, %c0_i32 : i32, i32, i32
  }
  func.func @transform_1(%arg0: i32, %arg1: i32) -> (i32, i32, i32) {
    %c0_i32 = arith.constant 0 : i32
    %c0_i32_0 = arith.constant 0 : i32
    %c0_i32_1 = arith.constant 0 : i32
    return %c0_i32, %arg0, %c0_i32_0 : i32, i32, i32
  }
  func.func @transform_2(%arg0: i32, %arg1: i32) -> (i32, i32, i32) {
    %c0_i32 = arith.constant 0 : i32
    %c0_i32_0 = arith.constant 0 : i32
    return %arg1, %arg0, %c0_i32 : i32, i32, i32
  }
}

</mosaic_0001>

<bundles_post_ra>
// kernel: tpu_custom_call.1
= control target key start
LH: loop header
LB: loop body
LE: loop exit
PB: predicated region body
PF: predicated region fallthrough
CT: control target
= control target key end

     0   :  { %s887_s0 = inlined_call_operand.hbm [shape: f32[2,16,128], index: 0, kind: input, shape index: {}]   ;;  %s888_s1 = inlined_call_operand.hbm [shape: f32[1,16,128], index: 1, kind: input, shape index: {}]   ;;  %s889_s2 = inlined_call_operand.hbm [shape: f32[2,16,128], index: 2, kind: output, shape index: {}]  }
   0x1   :  { %893 = sst [smem:[#allocation14_spill]] %s887_s0 }
   0x2   :  { %7 = vsyncpa [#allocation3], 0 }
   0x3   :  { %9 = vsyncpa [#allocation3 + $0x1], 0 }
   0x4   :  { %10 = vsyncpa [#allocation6], 0 }
   0x5   :  { %12 = vsyncpa [#allocation6 + $0x1], 0 }
   0x6   :  { %13 = vsyncpa [#allocation4], 0 }
   0x7   :  { %15 = vsyncpa [#allocation4 + $0x1], 0  ;;  %s676_s9 = smov 0   ;;  %s678_s10 = smov 0  }
   0x8   :  { %s680_s11 = smov 0   ;;  %s682_s12 = smov 0  }
   0x9   :  { %s684_s13 = smov 0   ;;  %s686_s14 = smov 0  }
   0xa   :  { %s688_s15 = smov 0   ;;  %s690_s16 = smov 0  }
   0xb   :  { %s692_s17 = smov 0   ;;  %s694_s18 = smov 0  }
   0xc   :  { %s696_s19 = smov 0  }
   0xd LB: > { %894 = sst [smem:[#allocation11_spill]] %s651_s17  ;;  %s348_s20 = sadd.s32 4294967295, %s659_s19   ;;  %s659_s19 = sphi %s696_s19, %s21_s19   ;;  %s655_s18 = sphi %s694_s18, %s915_s18   ;;  %s651_s17 = sphi %s692_s17, %s906_s17   ;;  %s647_s16 = sphi %s690_s16, %s914_s16   ;;  %s643_s15 = sphi %s688_s15, %s905_s15   ;;  %s639_s14 = sphi %s686_s14, %s913_s14   ;;  %s635_s13 = sphi %s684_s13, %s912_s13   ;;  %s631_s12 = sphi %s682_s12, %s911_s12   ;;  %s627_s11 = sphi %s680_s11, %s910_s11   ;;  %s623_s10 = sphi %s678_s10, %s909_s10   ;;  %s619_s9 = sphi %s676_s9, %s908_s9  }
   0xe   : > { %s349_s21 = sadd.s32 4294967294, %s659_s19   ;;  %s30_s22 = sadd.s32 1, %s651_s17 }
   0xf   : > { %s33_s23 = sadd.s32 1, %s655_s18  ;;  %p31_p0 = scmp.ge.s32.totalorder %s30_s22, 2 }
  0x10   : > { %s42_s24 = sadd.s32 1, %s639_s14  ;;  %p49_p1 = scmp.ne.s32.totalorder %s639_s14, %s635_s13 }
  0x11   : > { %p50_p2 = scmp.eq.s32.totalorder %s659_s19, 0  ;;  %s917_s22 = smov (%p31_p0, %s30_s22), 0 }
  0x12   : > { %895 = sst [smem:[#allocation12_spill]] %s917_s22  ;;  %s919_s23 = smov (!%p31_p0, %s33_s23), %s655_s18 }
  0x13   : > { %s37_s25 = ssub.s32 %s651_s17, %s917_s22  ;;  %p746_p3 = por %p50_p2, %p49_p1 }
  0x14   : > { %p35_p4 = scmp.ge.s32.totalorder %s919_s23, 2  ;;  %p55_p5 = scmp.ne.s32.totalorder %s635_s13, %s631_s12 }
  0x15   : > { %p752_p6 = scmp.eq.s32.totalorder %s348_s20, 0  ;;  %p107_p7 = scmp.eq.s32.totalorder %s348_s20, 3 }
  0x16   : > { %s921_s23 = smov (%p35_p4, %s919_s23), 0  ;;  %p113_p10 = scmp.eq.s32.totalorder %s349_s21, 3 }
  0x17   : > { %898 = sst [smem:[#allocation13_spill]] %s921_s23  ;;  %p760_p8 = por %p752_p6, %p55_p5 }
  0x18   : > { %p764_p9 = por %p107_p7, %p49_p1  ;;  %s38_s30 = ssub.s32 %s655_s18, %s921_s23 }
  0x19   : > { %s39_s3 = sor.u32 %s38_s30, %s37_s25  ;;  %p66_p11 = scmp.eq.s32.totalorder %s38_s30, 0 }
  0x1a   : > { %p40_p12 = scmp.eq.s32.totalorder %s39_s3, 0  ;;  %p770_p13 = por %p113_p10, %p55_p5 }
  0x1b   : > { %p383_p0 = scmp.lt.s32.totalorder %s659_s19, 4  ;;  %s133_s6 = sand.u32 1, %s639_s14  }
  0x1c   : > { %s776_s5 = scalar_select %p40_p12, %s639_s14, %s42_s24  }
  0x1d   : > { %s353_s7 = sshll.u32 %s651_s17, 1  ;;  %s352_s8 = sshll.u32 %s133_s6, 3 }
  0x1e   : > { %s141_s20 = sadd.s32 %s655_s18, %s353_s7  ;;  %s137_s25 = scalar_lea.vmem [#allocation2], %s352_s8 }
  0x1f   : > { %s354_s21 = sshll.u32 %s141_s20, 3  ;;  %s147_s3 = sshll.u32 %s137_s25, 4  ;;  %s148_s3 = int_to_ptr.vmem [resolvable:$true] %s147_s3 }
  0x20   : > { %s902_s0 = sld [smem:[#allocation14_spill]]  ;;  %p373_p1 = pnand %p383_p0, %p746_p3 }
  0x21   : > { %p357_p4 = scmp.ge.s32.totalorder %s659_s19, 1  ;;  %p171_p5 = scmp.lt.s32.totalorder %s659_s19, 5 }
  0x22   : > { %s134_s7 = scalar_lea.sflag [#allocation3], %s133_s6  ;;  %s68_s22 = sadd.s32 1, %s627_s11 }
  0x23   : > { %p790_p7 = pnand %p357_p4, %p171_p5  ;;  %p75_p10 = scmp.ne.s32.totalorder %s627_s11, %s623_s10 }
  0x24   : > { %s797_s23 = scalar_select %p66_p11, %s627_s11, %s68_s22  }
  0x25   : > { %p81_p12 = scmp.ne.s32.totalorder %s623_s10, %s619_s9  ;;  %s154_s20 = sand.u32 1, %s627_s11  }
  0x26   : > { %s143_s24 = scalar_lea.hbm %s902_s0, %s354_s21  ;;  %s356_s26 = sshll.u32 %s655_s18, 3 }
  0x27   : > { %s145_s17 = sshll.u32 %s143_s24, 4  ;;  %p807_p3 = por %p81_p12, %p752_p6  ;;  %s146_s17 = int_to_ptr.hbm [resolvable:$true] %s145_s17 }
  0x28   : > { %375 = dma.hbm_to_vmem [thread:$0]  (!%p373_p1), %s146_s17, 128, %s148_s3, %s134_s7  }
  0x29   : > { %p77_p1 = por %p75_p10, %p50_p2  ;;  %s355_s17 = sshll.u32 %s154_s20, 3 }
  0x2a   : > { %s162_s3 = scalar_lea.hbm %s888_s1, %s356_s26  ;;  %s158_s30 = scalar_lea.vmem [#allocation5], %s355_s17 }
  0x2b   : > { %s164_s24 = sshll.u32 %s162_s3, 4  ;;  %s166_s7 = sshll.u32 %s158_s30, 4  ;;  %s165_s24 = int_to_ptr.hbm [resolvable:$true] %s164_s24  ;;  %s167_s7 = int_to_ptr.vmem [resolvable:$true] %s166_s7 }
  0x2c   : > { %p376_p11 = pnand %p383_p0, %p77_p1  ;;  %s155_s9 = scalar_lea.sflag [#allocation6], %s154_s20 }
  0x2d   : > { %175 = sbr.rel (%p790_p7) target bundleno = 72 (0x48), region = 28  ;;  %s821_s27 = sand.u32 (!%p790_p7), 1, %s635_s13  }
  0x2e   : > { %378 = dma.hbm_to_vmem [thread:$0]  (!%p376_p11), %s165_s24, 128, %s167_s7, %s155_s9  }
  0x2f   : > { %s358_s22 = sshll.u32 (!%p790_p7), %s821_s27, 3  ;;  %s178_s26 = scalar_lea.sflag (!%p790_p7), [#allocation3], %s821_s27 }
  0x30   : > { %s181_s6 = scalar_lea.vmem (!%p790_p7), [#allocation2], %s358_s22 }
  0x32   : > { %606 = dma.done.wait (%p760_p8), %s178_s26, 128  }
  0x33   : > { %608 = vsyncadd (%p760_p8), %s178_s26, 4294967168  ;;  %s187_s20 = sand.u32 1, %s623_s10  }
  0x34   : > { %s359_s17 = sshll.u32 %s187_s20, 3  ;;  %s188_s8 = scalar_lea.sflag [#allocation6], %s187_s20 }
  0x35   : > { %s191_s25 = scalar_lea.vmem [#allocation5], %s359_s17 }
  0x36   : > { %610 = dma.done.wait (%p807_p3), %s188_s8, 128  }
  0x37   : > { %612 = vsyncadd (%p807_p3), %s188_s8, 4294967168  ;;  %s362_s3 = sshll.u32 %s643_s15, 1  ;;  %s217_s26 = scalar_lea.vmem [#allocation7], %s358_s22  ;;  %v218_v0 = vld [vmem:[%s181_s6] sm:$0xff]  ;;  %v219_v1 = vld [vmem:[%s191_s25] sm:$0xff] }
  0x38   : > { %s233_s24 = sadd.s32 %s647_s16, %s362_s3  ;;  %s237_s0 = sshll.u32 %s217_s26, 4  ;;  %v220_v2 = vadd.f32 %v219_v1, %v218_v0  ;;  %s238_s0 = int_to_ptr.vmem [resolvable:$true] %s237_s0 }
  0x39   : > { %s363_s30 = sshll.u32 %s233_s24, 3  ;;  %s223_s21 = scalar_lea.sflag [#allocation4], %s821_s27 }
  0x3a   : > { %s235_s9 = scalar_lea.hbm %s889_s2, %s363_s30  ;;  %221 = vst [vmem:[%s217_s26] sm:$0xff] %v220_v2  ;;  %s553_s22 = scalar_lea.hbm %s889_s2, 32 }
  0x3b   : > { %s239_s20 = sshll.u32 %s235_s9, 4  ;;  %s240_s20 = int_to_ptr.hbm [resolvable:$true] %s239_s20 }
  0x3c   : > { %s547_s17 = sshra.s32 %s240_s20, 4  ;;  %s548_s17 = int_to_ptr.hbm [resolvable:$true] %s547_s17 }
  0x3d   : > { %s549_s15 = scalar_lea.hbm %s548_s17, 8  ;;  %p554_p0 = scmp.lt.s32.totalorder %s548_s17, %s889_s2 }
  0x3e   : > { %p550_p2 = scmp.ne.s32.totalorder %s548_s17, %s549_s15  ;;  %p555_p4 = scmp.lt.s32.totalorder %s553_s22, %s549_s15 }
  0x40   : > { %p551_p6 = pnand %p550_p2, %p764_p9  ;;  %p556_p5 = por %p555_p4, %p554_p0 }
  0x42   : > { %p552_p8 = pneg %p551_p6 }
  0x44   : > { %p557_p7 = pnand %p556_p5, %p552_p8 }
  0x46   : > { %560 = shalt.err (!%p557_p7)
}
  0x47   : > { %370 = dma.vmem_to_hbm [thread:$0]  (%p764_p9), %s238_s0, 128, %s240_s20, %s223_s21  }
  0x48 PF: > { %p384_p10 = scmp.ge.s32.totalorder %s659_s19, 2  ;;  %s251_s27 = sand.u32 1, %s631_s12  }
  0x49   : > { %s252_s6 = scalar_lea.sflag [#allocation4], %s251_s27 }
  0x4a   : > { %p380_p12 = pnand %p384_p10, %p770_p13 }
  0x4c   : > { %p381_p3 = pneg %p380_p12 }
  0x4e   : > { %614 = dma.done.wait (%p381_p3), %s252_s6, 128  }
  0x4f   : > { %616 = vsyncadd (%p381_p3), %s252_s6, 4294967168  ;;  %s21_s19 = sadd.s32 1, %s659_s19   ;;  %s905_s15 = sld [smem:[#allocation11_spill]] }
  0x50   : > { %p18_p1 = scmp.ge.s32.totalorder %s21_s19, 6   ;;  %s906_s17 = sld [smem:[#allocation12_spill]] }
  0x51   : > { %s907_s0 = sld [smem:[#allocation13_spill]]  ;;  %s908_s9 = smov %s623_s10 }
  0x52   : > { %s909_s10 = smov %s627_s11  ;;  %s910_s11 = smov %s797_s23 }
  0x53   : > { %s911_s12 = smov %s635_s13  ;;  %s912_s13 = smov %s639_s14 }
  0x54   : > { %s913_s14 = smov %s776_s5  ;;  %s914_s16 = smov %s655_s18 }
  0x55   :  { %20 = sbr.rel (!%p18_p1) target bundleno = 13 (0xd), region = 86 }
  0x57   : > { %s915_s18 = smov %s907_s0 }
  0x5a   :  { %258 = vsyncpa [#allocation3], 1 }
  0x5b   :  { %260 = vsyncpa [#allocation3 + $0x1], 1 }
  0x5c   :  { %261 = vsyncpa [#allocation6], 1 }
  0x5d   :  { %263 = vsyncpa [#allocation6 + $0x1], 1 }
  0x5e   :  { %264 = vsyncpa [#allocation4], 1 }
  0x5f   :  { %266 = vsyncpa [#allocation4 + $0x1], 1 }

</bundles_post_ra>
